<compile_context>
chip_gen: v7x
topology: tpu7x:2x2x1
jax: 0.10.0
libtpu: 0.0.40
codegen_flags: <defaults>
</compile_context>

<pallas_src>
import numpy as np
import jax
import jax.numpy as jnp
from jax import lax
from jax.experimental import pallas as pl
from jax.experimental.pallas import tpu as pltpu


# --------------------------- Pallas kernel -----------------------------------

def _net_kernel(xce_ref, xco_ref, m1_ref, m2_ref, wf_ref, b_ref, out_ref, p1_ref):
    """Fused Net forward for one batch tile.

    xce_ref/xco_ref : (TB, 16, 140) bf16 im2col'd input, even/odd conv1 output rows.
    m1_ref          : (140, 256) bf16 conv1 weight with W-pool selection folded in
                      (even pooled cols at lanes [0:120], odd at [128:248], rest 0).
    m2_ref          : (640, 256) bf16 conv2 weight, K = 5 row-shifts x 128 lanes,
                      W-pool selection folded in ([0:80] even, [128:208] odd).
    wf_ref          : (512, 10)  bf16 FC weight, rows = 4 pooled rows x 128 lanes
                      (CHW flatten order absorbed; pad rows are zero).
    b_ref           : (3, 128)  f32 packed biases: row0 conv1 (pooled layout),
                      row1 conv2 (pooled layout), row2[:10] fc.
    out_ref         : (TB, 10)  f32 logits.
    p1_ref          : (SB, 16, 128) f32 VMEM scratch (pooled conv1, rows >=12 junk,
                      lanes >=120 zero).
    """
    f32 = jnp.float32
    bf16 = jnp.bfloat16
    TB = out_ref.shape[0]
    SB = p1_ref.shape[0]
    n_sub = TB // SB

    b1p = b_ref[0:1, :]          # (1,128) f32, lanes >=120 are zero
    b2p = b_ref[1:2, :]          # (1,128) f32, lanes >=80  are zero
    bfc = b_ref[2:3, 0:10]       # (1,10)  f32

    for c in range(n_sub):       # short static loop over <=4-sample sub-chunks
        s0 = c * SB

        # ---- conv1 (one K=140 dot per row parity) + 2x2 max-pool.
        # W-pool: the selection is folded into m1 -> max of the two 128-lane halves.
        # H-pool: elementwise max of the even-row / odd-row parity results.
        def conv1_pool(x_ref):
            lhs = x_ref[s0:s0 + SB, :, :].reshape(SB * 16, 140)            # bf16
            z = jnp.dot(lhs, m1_ref[...], preferred_element_type=f32)      # (SB*16,256)
            return jnp.maximum(z[:, 0:128], z[:, 128:256])                 # (SB*16,128)

        p1 = jnp.maximum(
            jnp.maximum(conv1_pool(xce_ref), conv1_pool(xco_ref)) + b1p, 0.0)
        p1_ref[...] = p1.reshape(SB, 16, 128)                              # lanes>=120 == 0

        # ---- conv2 as ONE K=640 dot: H-direction im2col = 5 row-shifted windows
        # of the pooled activation, each a full 128-lane group (aligned concat).
        lhs2 = jnp.concatenate(
            [p1_ref[:, di:di + 8, :].reshape(SB * 8, 128) for di in range(5)],
            axis=1).astype(bf16)                                           # (SB*8,640)
        z2 = jnp.dot(lhs2, m2_ref[...], preferred_element_type=f32)        # (SB*8,256)
        q = jnp.maximum(jnp.maximum(z2[:, 0:128], z2[:, 128:256]) + b2p, 0.0)
        q3 = q.reshape(SB, 8, 128)                                         # lanes>=80 == 0

        # ---- H-pool of conv2 + flatten + FC as ONE K=512 dot.
        ph = jnp.concatenate(
            [jnp.maximum(q3[:, 2 * h, :], q3[:, 2 * h + 1, :]) for h in range(4)],
            axis=1).astype(bf16)                                           # (SB,512)
        out_ref[s0:s0 + SB, :] = (
            jnp.dot(ph, wf_ref[...], preferred_element_type=f32) + bfc)


# --------------------------- weight preparation (hoisted, one-time) ----------

def prepare_params(params):
    """Repack PyTorch-layout weights into the bf16 matrices the kernel consumes."""
    w1, b1, w2, b2, wf, bf = (p.astype(jnp.float32) for p in params)
    f32 = jnp.float32
    bf16 = jnp.bfloat16

    # conv1 band tensor: M1[di, w, j, c] = w1[c,0,di,w-j] for 0 <= w-j < 5.
    w1k = jnp.transpose(w1[:, 0], (1, 2, 0))                    # (5 di, 5 dj, 10 c)
    M1 = jnp.zeros((5, 28, 24, 10), f32)
    j1 = jnp.arange(24)
    for dj in range(5):
        M1 = M1.at[:, j1 + dj, j1, :].set(
            jnp.broadcast_to(w1k[:, dj, None, :], (5, 24, 10)))
    # Fold the W-direction 2x2 pool selection: even output cols -> lanes [0:120],
    # odd -> [128:248]; pad lanes stay exactly zero.
    M1e = M1[:, :, 0::2, :].reshape(5, 28, 120)
    M1o = M1[:, :, 1::2, :].reshape(5, 28, 120)
    M1P = (jnp.zeros((5, 28, 256), f32)
           .at[:, :, :120].set(M1e)
           .at[:, :, 128:248].set(M1o)).reshape(140, 256).astype(bf16)

    # conv2 band tensor: M2[di, w, c, j, o] = w2[o,c,di,w-j] for 0 <= w-j < 5.
    w2k = jnp.transpose(w2, (2, 3, 1, 0))                       # (5 di, 5 dj, 10 c, 20 o)
    M2 = jnp.zeros((5, 12, 10, 8, 20), f32)
    j2 = jnp.arange(8)
    for dj in range(5):
        M2 = M2.at[:, j2 + dj, :, j2, :].set(
            jnp.broadcast_to(w2k[:, dj], (8, 5, 10, 20)))
    M2f = M2.reshape(5, 120, 8, 20)
    M2e = M2f[:, :, 0::2, :].reshape(5, 120, 80)
    M2o = M2f[:, :, 1::2, :].reshape(5, 120, 80)
    M2sel = (jnp.zeros((5, 120, 256), f32)
             .at[:, :, :80].set(M2e)
             .at[:, :, 128:208].set(M2o))
    # Pad each K-chunk to 128 rows so it lines up with the 128-lane padded LHS.
    M2S = (jnp.zeros((5, 128, 256), f32)
           .at[:, :120, :].set(M2sel)).reshape(640, 256).astype(bf16)

    # FC weight regrouped by pooled row h (absorbs PyTorch's CHW flatten):
    # WFP[h*128 + k*20+o, m] = wf[m, o*16 + h*4 + k]; pad rows are zero.
    WF = jnp.transpose(wf.reshape(10, 20, 4, 4), (2, 3, 1, 0)).reshape(4, 80, 10)
    WFP = (jnp.zeros((4, 128, 10), f32)
           .at[:, :80, :].set(WF)).reshape(512, 10).astype(bf16)

    # Packed biases (f32; all elementwise math stays f32 in-kernel).
    B = jnp.zeros((3, 128), f32)
    B = B.at[0, :120].set(jnp.tile(b1, 12))   # conv1 bias in pooled (k*10+c) layout
    B = B.at[1, :80].set(jnp.tile(b2, 4))     # conv2 bias in pooled (k*20+o) layout
    B = B.at[2, :10].set(bf)                  # fc bias
    return (M1P, M2S, WFP, B)


# --------------------------- wrapper ------------------------------------------

def net_forward(x_nchw, prepped):
    M1P, M2S, WFP, B = prepped
    n = x_nchw.shape[0]

    # Batch tiling: single step for tiny batches; >=2 parallel steps when n > 8
    # (v7x megacore); TB=16 for large batches to amortize grid-step overhead.
    if n <= 8:
        TB, n_pad = n, n
    elif n <= 32:
        TB, n_pad = 8, ((n + 7) // 8) * 8
    else:
        TB, n_pad = 16, ((n + 15) // 16) * 16
    SB = 4 if TB % 4 == 0 else TB            # in-kernel sub-chunk (bounds vreg pressure)

    # Split input rows by parity and im2col the 5 H-shifts once in the wrapper,
    # so conv1 is a single K=140 dot per parity with no in-kernel row shifts.
    x2 = x_nchw[:, 0].astype(jnp.float32)                        # (n, 28, 28)
    pad_n = n_pad - n
    xe = jnp.pad(x2[:, 0::2, :], ((0, pad_n), (0, 4), (0, 0)))   # (n_pad, 18, 28)
    xo = jnp.pad(x2[:, 1::2, :], ((0, pad_n), (0, 4), (0, 0)))
    xcat_e = jnp.concatenate(
        [xe[:, 0:16], xo[:, 0:16], xe[:, 1:17], xo[:, 1:17], xe[:, 2:18]],
        axis=2).astype(jnp.bfloat16)                             # (n_pad, 16, 140)
    xcat_o = jnp.concatenate(
        [xo[:, 0:16], xe[:, 1:17], xo[:, 1:17], xe[:, 2:18], xo[:, 2:18]],
        axis=2).astype(jnp.bfloat16)

    out = pl.pallas_call(
        _net_kernel,
        out_shape=jax.ShapeDtypeStruct((n_pad, 10), jnp.float32),
        grid=(n_pad // TB,),
        in_specs=[
            pl.BlockSpec((TB, 16, 140), lambda i: (i, 0, 0)),
            pl.BlockSpec((TB, 16, 140), lambda i: (i, 0, 0)),
            pl.BlockSpec((140, 256), lambda i: (0, 0)),
            pl.BlockSpec((640, 256), lambda i: (0, 0)),
            pl.BlockSpec((512, 10), lambda i: (0, 0)),
            pl.BlockSpec((3, 128), lambda i: (0, 0)),
        ],
        out_specs=pl.BlockSpec((TB, 10), lambda i: (i, 0)),
        scratch_shapes=[pltpu.VMEM((SB, 16, 128), jnp.float32)],
        compiler_params=pltpu.CompilerParams(dimension_semantics=("parallel",)),
    )(xcat_e, xcat_o, M1P, M2S, WFP, B)
    return out[:n]


# --------------------------- pure-JAX reference -------------------------------

def net_forward_ref(x, params):
    w1, b1, w2, b2, wf, bf = params

    def conv(h, w, b):
        y = lax.conv_general_dilated(
            h, w, window_strides=(1, 1), padding="VALID",
            dimension_numbers=("NCHW", "OIHW", "NCHW"),
            precision=lax.Precision.HIGHEST)
        return y + b[None, :, None, None]

    def mp(h):
        return lax.reduce_window(h, -jnp.inf, lax.max,
                                 (1, 1, 2, 2), (1, 1, 2, 2), "VALID")

    h = jax.nn.relu(mp(conv(x, w1, b1)))
    h = jax.nn.relu(mp(conv(h, w2, b2)))
    h = h.reshape(x.shape[0], -1)
    return jnp.dot(h, wf.T, precision=lax.Precision.HIGHEST) + bf


# --------------------------- main ---------------------------------------------

if __name__ == "__main__":
    key = jax.random.PRNGKey(0)
    ks = jax.random.split(key, 7)

    def uinit(k, shape, fan_in):
        bound = 1.0 / float(np.sqrt(fan_in))
        return jax.random.uniform(k, shape, jnp.float32, -bound, bound)

    # Deterministic synthetic parameters in PyTorch layouts/shapes.
    w1 = uinit(ks[0], (10, 1, 5, 5), 1 * 5 * 5)
    b1 = uinit(ks[1], (10,), 1 * 5 * 5)
    w2 = uinit(ks[2], (20, 10, 5, 5), 10 * 5 * 5)
    b2 = uinit(ks[3], (20,), 10 * 5 * 5)
    wf = uinit(ks[4], (10, 320), 320)
    bf = uinit(ks[5], (10,), 320)
    params = (w1, b1, w2, b2, wf, bf)

    # MNIST-sized input is forced by fc(320) => 28x28; keep batch small.
    x = jax.random.normal(ks[6], (2, 1, 28, 28), jnp.float32)

    prepped = prepare_params(params)          # one-time weight repacking (hoisted)
    fwd = jax.jit(net_forward)
    out = jax.block_until_ready(fwd(x, prepped))

    ref = jax.block_until_ready(net_forward_ref(x, params))
    # Tolerance covers bf16-operand MXU matmuls with f32 accumulation.
    np.testing.assert_allclose(np.asarray(out), np.asarray(ref),
                               rtol=2e-2, atol=2e-2)
    assert out.shape == (2, 10) and out.dtype == jnp.float32
    print("KERNEL_OK")
</pallas_src>

<mosaic_0001>
module attributes {stable_mosaic.version = 11 : i64} {
  func.func @_net_kernel(%arg0: i32, %arg1: memref<2x16x140xbf16, #tpu.memory_space<vmem>>, %arg2: memref<2x16x140xbf16, #tpu.memory_space<vmem>>, %arg3: memref<140x256xbf16, #tpu.memory_space<vmem>>, %arg4: memref<640x256xbf16, #tpu.memory_space<vmem>>, %arg5: memref<512x10xbf16, #tpu.memory_space<vmem>>, %arg6: memref<3x128xf32, #tpu.memory_space<vmem>>, %arg7: memref<2x10xf32, #tpu.memory_space<vmem>>, %arg8: memref<2x16x128xf32, #tpu.memory_space<vmem>>) attributes {dimension_semantics = [#tpu.dimension_semantics<parallel>], iteration_bounds = array<i64: 1>, scalar_prefetch = 0 : i64, scratch_operands = 1 : i64, tpu.core_type = #tpu.core_type<tc>, window_params = [{transform_indices = @transform_0, window_bounds = array<i64: 2, 16, 140>}, {transform_indices = @transform_1, window_bounds = array<i64: 2, 16, 140>}, {pipeline_mode = #tpu.pipeline_mode<synchronous>, transform_indices = @transform_2, window_bounds = array<i64: 140, 256>}, {pipeline_mode = #tpu.pipeline_mode<synchronous>, transform_indices = @transform_3, window_bounds = array<i64: 640, 256>}, {pipeline_mode = #tpu.pipeline_mode<synchronous>, transform_indices = @transform_4, window_bounds = array<i64: 512, 10>}, {pipeline_mode = #tpu.pipeline_mode<synchronous>, transform_indices = @transform_5, window_bounds = array<i64: 3, 128>}, {transform_indices = @transform_6, window_bounds = array<i64: 2, 10>}]} {
    %c0 = arith.constant 0 : index
    %c0_0 = arith.constant 0 : index
    %0 = vector.load %arg6[%c0, %c0_0] : memref<3x128xf32, #tpu.memory_space<vmem>>, vector<1x128xf32>
    %c1 = arith.constant 1 : index
    %c0_1 = arith.constant 0 : index
    %1 = vector.load %arg6[%c1, %c0_1] : memref<3x128xf32, #tpu.memory_space<vmem>>, vector<1x128xf32>
    %c2 = arith.constant 2 : index
    %c0_2 = arith.constant 0 : index
    %2 = vector.load %arg6[%c2, %c0_2] : memref<3x128xf32, #tpu.memory_space<vmem>>, vector<1x10xf32>
    %c0_3 = arith.constant 0 : index
    %c0_4 = arith.constant 0 : index
    %c0_5 = arith.constant 0 : index
    %3 = vector.load %arg1[%c0_3, %c0_4, %c0_5] : memref<2x16x140xbf16, #tpu.memory_space<vmem>>, vector<2x16x140xbf16>
    %4 = vector.shape_cast %3 : vector<2x16x140xbf16> to vector<32x140xbf16>
    %c0_6 = arith.constant 0 : index
    %c0_7 = arith.constant 0 : index
    %5 = vector.load %arg3[%c0_6, %c0_7] : memref<140x256xbf16, #tpu.memory_space<vmem>>, vector<140x256xbf16>
    %cst = arith.constant dense<0.000000e+00> : vector<32x256xf32>
    %6 = tpu.matmul %4, %5, %cst {dimension_numbers = #tpu.dot_dimension_numbers<[1], [0], [0], [1], [0, 0, 1, 1], [], []>} : vector<32x140xbf16>, vector<140x256xbf16>, vector<32x256xf32> -> vector<32x256xf32>
    %7 = vector.extract_strided_slice %6 {offsets = [0, 0], sizes = [32, 128], strides = [1, 1]} : vector<32x256xf32> to vector<32x128xf32>
    %8 = vector.extract_strided_slice %6 {offsets = [0, 128], sizes = [32, 128], strides = [1, 1]} : vector<32x256xf32> to vector<32x128xf32>
    %9 = arith.maximumf %7, %8 : vector<32x128xf32>
    %c0_8 = arith.constant 0 : index
    %c0_9 = arith.constant 0 : index
    %c0_10 = arith.constant 0 : index
    %10 = vector.load %arg2[%c0_8, %c0_9, %c0_10] : memref<2x16x140xbf16, #tpu.memory_space<vmem>>, vector<2x16x140xbf16>
    %11 = vector.shape_cast %10 : vector<2x16x140xbf16> to vector<32x140xbf16>
    %c0_11 = arith.constant 0 : index
    %c0_12 = arith.constant 0 : index
    %12 = vector.load %arg3[%c0_11, %c0_12] : memref<140x256xbf16, #tpu.memory_space<vmem>>, vector<140x256xbf16>
    %cst_13 = arith.constant dense<0.000000e+00> : vector<32x256xf32>
    %13 = tpu.matmul %11, %12, %cst_13 {dimension_numbers = #tpu.dot_dimension_numbers<[1], [0], [0], [1], [0, 0, 1, 1], [], []>} : vector<32x140xbf16>, vector<140x256xbf16>, vector<32x256xf32> -> vector<32x256xf32>
    %14 = vector.extract_strided_slice %13 {offsets = [0, 0], sizes = [32, 128], strides = [1, 1]} : vector<32x256xf32> to vector<32x128xf32>
    %15 = vector.extract_strided_slice %13 {offsets = [0, 128], sizes = [32, 128], strides = [1, 1]} : vector<32x256xf32> to vector<32x128xf32>
    %16 = arith.maximumf %14, %15 : vector<32x128xf32>
    %17 = arith.maximumf %9, %16 : vector<32x128xf32>
    %18 = vector.broadcast %0 : vector<1x128xf32> to vector<32x128xf32>
    %19 = arith.addf %17, %18 : vector<32x128xf32>
    %cst_14 = arith.constant 0.000000e+00 : f32
    %20 = vector.broadcast %cst_14 : f32 to vector<32x128xf32>
    %21 = arith.maximumf %19, %20 : vector<32x128xf32>
    %22 = vector.shape_cast %21 : vector<32x128xf32> to vector<2x16x128xf32>
    %c0_15 = arith.constant 0 : index
    %c0_16 = arith.constant 0 : index
    %c0_17 = arith.constant 0 : index
    %23 = vector.load %arg8[%c0_15, %c0_16, %c0_17] : memref<2x16x128xf32, #tpu.memory_space<vmem>>, vector<2x16x128xf32>
    tpu.vector_store %arg8[%c0_15, %c0_16, %c0_17], %22 {strides = array<i32>} : memref<2x16x128xf32, #tpu.memory_space<vmem>>, vector<2x16x128xf32>,
    %c0_18 = arith.constant 0 : index
    %c0_19 = arith.constant 0 : index
    %c0_20 = arith.constant 0 : index
    %24 = vector.load %arg8[%c0_18, %c0_19, %c0_20] : memref<2x16x128xf32, #tpu.memory_space<vmem>>, vector<2x8x128xf32>
    %25 = vector.shape_cast %24 : vector<2x8x128xf32> to vector<16x128xf32>
    %c0_21 = arith.constant 0 : index
    %c1_22 = arith.constant 1 : index
    %c0_23 = arith.constant 0 : index
    %26 = vector.load %arg8[%c0_21, %c1_22, %c0_23] : memref<2x16x128xf32, #tpu.memory_space<vmem>>, vector<2x8x128xf32>
    %27 = vector.shape_cast %26 : vector<2x8x128xf32> to vector<16x128xf32>
    %c0_24 = arith.constant 0 : index
    %c2_25 = arith.constant 2 : index
    %c0_26 = arith.constant 0 : index
    %28 = vector.load %arg8[%c0_24, %c2_25, %c0_26] : memref<2x16x128xf32, #tpu.memory_space<vmem>>, vector<2x8x128xf32>
    %29 = vector.shape_cast %28 : vector<2x8x128xf32> to vector<16x128xf32>
    %c0_27 = arith.constant 0 : index
    %c3 = arith.constant 3 : index
    %c0_28 = arith.constant 0 : index
    %30 = vector.load %arg8[%c0_27, %c3, %c0_28] : memref<2x16x128xf32, #tpu.memory_space<vmem>>, vector<2x8x128xf32>
    %31 = vector.shape_cast %30 : vector<2x8x128xf32> to vector<16x128xf32>
    %c0_29 = arith.constant 0 : index
    %c4 = arith.constant 4 : index
    %c0_30 = arith.constant 0 : index
    %32 = vector.load %arg8[%c0_29, %c4, %c0_30] : memref<2x16x128xf32, #tpu.memory_space<vmem>>, vector<2x8x128xf32>
    %33 = vector.shape_cast %32 : vector<2x8x128xf32> to vector<16x128xf32>
    %34 = tpu.concatenate %25, %27, %29, %31, %33 in 1 : vector<16x128xf32>, vector<16x128xf32>, vector<16x128xf32>, vector<16x128xf32>, vector<16x128xf32> -> vector<16x640xf32>
    %35 = arith.truncf %34 : vector<16x640xf32> to vector<16x640xbf16>
    %c0_31 = arith.constant 0 : index
    %c0_32 = arith.constant 0 : index
    %36 = vector.load %arg4[%c0_31, %c0_32] : memref<640x256xbf16, #tpu.memory_space<vmem>>, vector<640x256xbf16>
    %cst_33 = arith.constant dense<0.000000e+00> : vector<16x256xf32>
    %37 = tpu.matmul %35, %36, %cst_33 {dimension_numbers = #tpu.dot_dimension_numbers<[1], [0], [0], [1], [0, 0, 1, 1], [], []>} : vector<16x640xbf16>, vector<640x256xbf16>, vector<16x256xf32> -> vector<16x256xf32>
    %38 = vector.extract_strided_slice %37 {offsets = [0, 0], sizes = [16, 128], strides = [1, 1]} : vector<16x256xf32> to vector<16x128xf32>
    %39 = vector.extract_strided_slice %37 {offsets = [0, 128], sizes = [16, 128], strides = [1, 1]} : vector<16x256xf32> to vector<16x128xf32>
    %40 = arith.maximumf %38, %39 : vector<16x128xf32>
    %41 = vector.broadcast %1 : vector<1x128xf32> to vector<16x128xf32>
    %42 = arith.addf %40, %41 : vector<16x128xf32>
    %cst_34 = arith.constant 0.000000e+00 : f32
    %43 = vector.broadcast %cst_34 : f32 to vector<16x128xf32>
    %44 = arith.maximumf %42, %43 : vector<16x128xf32>
    %45 = vector.shape_cast %44 : vector<16x128xf32> to vector<2x8x128xf32>
    %46 = vector.extract_strided_slice %45 {offsets = [0, 0, 0], sizes = [2, 1, 128], strides = [1, 1, 1]} : vector<2x8x128xf32> to vector<2x1x128xf32>
    %47 = vector.shape_cast %46 : vector<2x1x128xf32> to vector<2x128xf32>
    %48 = vector.extract_strided_slice %45 {offsets = [0, 1, 0], sizes = [2, 1, 128], strides = [1, 1, 1]} : vector<2x8x128xf32> to vector<2x1x128xf32>
    %49 = vector.shape_cast %48 : vector<2x1x128xf32> to vector<2x128xf32>
    %50 = arith.maximumf %47, %49 : vector<2x128xf32>
    %51 = vector.extract_strided_slice %45 {offsets = [0, 2, 0], sizes = [2, 1, 128], strides = [1, 1, 1]} : vector<2x8x128xf32> to vector<2x1x128xf32>
    %52 = vector.shape_cast %51 : vector<2x1x128xf32> to vector<2x128xf32>
    %53 = vector.extract_strided_slice %45 {offsets = [0, 3, 0], sizes = [2, 1, 128], strides = [1, 1, 1]} : vector<2x8x128xf32> to vector<2x1x128xf32>
    %54 = vector.shape_cast %53 : vector<2x1x128xf32> to vector<2x128xf32>
    %55 = arith.maximumf %52, %54 : vector<2x128xf32>
    %56 = vector.extract_strided_slice %45 {offsets = [0, 4, 0], sizes = [2, 1, 128], strides = [1, 1, 1]} : vector<2x8x128xf32> to vector<2x1x128xf32>
    %57 = vector.shape_cast %56 : vector<2x1x128xf32> to vector<2x128xf32>
    %58 = vector.extract_strided_slice %45 {offsets = [0, 5, 0], sizes = [2, 1, 128], strides = [1, 1, 1]} : vector<2x8x128xf32> to vector<2x1x128xf32>
    %59 = vector.shape_cast %58 : vector<2x1x128xf32> to vector<2x128xf32>
    %60 = arith.maximumf %57, %59 : vector<2x128xf32>
    %61 = vector.extract_strided_slice %45 {offsets = [0, 6, 0], sizes = [2, 1, 128], strides = [1, 1, 1]} : vector<2x8x128xf32> to vector<2x1x128xf32>
    %62 = vector.shape_cast %61 : vector<2x1x128xf32> to vector<2x128xf32>
    %63 = vector.extract_strided_slice %45 {offsets = [0, 7, 0], sizes = [2, 1, 128], strides = [1, 1, 1]} : vector<2x8x128xf32> to vector<2x1x128xf32>
    %64 = vector.shape_cast %63 : vector<2x1x128xf32> to vector<2x128xf32>
    %65 = arith.maximumf %62, %64 : vector<2x128xf32>
    %66 = tpu.concatenate %50, %55, %60, %65 in 1 : vector<2x128xf32>, vector<2x128xf32>, vector<2x128xf32>, vector<2x128xf32> -> vector<2x512xf32>
    %67 = arith.truncf %66 : vector<2x512xf32> to vector<2x512xbf16>
    %c0_35 = arith.constant 0 : index
    %c0_36 = arith.constant 0 : index
    %68 = vector.load %arg5[%c0_35, %c0_36] : memref<512x10xbf16, #tpu.memory_space<vmem>>, vector<512x10xbf16>
    %cst_37 = arith.constant dense<0.000000e+00> : vector<2x10xf32>
    %69 = tpu.matmul %67, %68, %cst_37 {dimension_numbers = #tpu.dot_dimension_numbers<[1], [0], [0], [1], [0, 0, 1, 1], [], []>} : vector<2x512xbf16>, vector<512x10xbf16>, vector<2x10xf32> -> vector<2x10xf32>
    %70 = vector.broadcast %2 : vector<1x10xf32> to vector<2x10xf32>
    %71 = arith.addf %69, %70 : vector<2x10xf32>
    %c0_38 = arith.constant 0 : index
    %c0_39 = arith.constant 0 : index
    %72 = vector.load %arg7[%c0_38, %c0_39] : memref<2x10xf32, #tpu.memory_space<vmem>>, vector<2x10xf32>
    tpu.vector_store %arg7[%c0_38, %c0_39], %71 {strides = array<i32>} : memref<2x10xf32, #tpu.memory_space<vmem>>, vector<2x10xf32>,
    return
  }
  func.func @transform_0(%arg0: i32) -> (i32, i32, i32) {
    %c0_i32 = arith.constant 0 : i32
    %c0_i32_0 = arith.constant 0 : i32
    %c0_i32_1 = arith.constant 0 : i32
    return %arg0, %c0_i32, %c0_i32_0 : i32, i32, i32
  }
  func.func @transform_1(%arg0: i32) -> (i32, i32, i32) {
    %c0_i32 = arith.constant 0 : i32
    %c0_i32_0 = arith.constant 0 : i32
    %c0_i32_1 = arith.constant 0 : i32
    return %arg0, %c0_i32, %c0_i32_0 : i32, i32, i32
  }
  func.func @transform_2(%arg0: i32) -> (i32, i32) {
    %c0_i32 = arith.constant 0 : i32
    %c0_i32_0 = arith.constant 0 : i32
    %c0_i32_1 = arith.constant 0 : i32
    return %c0_i32, %c0_i32_0 : i32, i32
  }
  func.func @transform_3(%arg0: i32) -> (i32, i32) {
    %c0_i32 = arith.constant 0 : i32
    %c0_i32_0 = arith.constant 0 : i32
    %c0_i32_1 = arith.constant 0 : i32
    return %c0_i32, %c0_i32_0 : i32, i32
  }
  func.func @transform_4(%arg0: i32) -> (i32, i32) {
    %c0_i32 = arith.constant 0 : i32
    %c0_i32_0 = arith.constant 0 : i32
    %c0_i32_1 = arith.constant 0 : i32
    return %c0_i32, %c0_i32_0 : i32, i32
  }
  func.func @transform_5(%arg0: i32) -> (i32, i32) {
    %c0_i32 = arith.constant 0 : i32
    %c0_i32_0 = arith.constant 0 : i32
    %c0_i32_1 = arith.constant 0 : i32
    return %c0_i32, %c0_i32_0 : i32, i32
  }
  func.func @transform_6(%arg0: i32) -> (i32, i32) {
    %c0_i32 = arith.constant 0 : i32
    %c0_i32_0 = arith.constant 0 : i32
    return %arg0, %c0_i32 : i32, i32
  }
}

</mosaic_0001>

<bundles_post_ra>
// kernel: net_forward.1
= control target key start
LH: loop header
LB: loop body
LE: loop exit
PB: predicated region body
PF: predicated region fallthrough
CT: control target
= control target key end

     0   :  { %vm156_vm0 = vcmask 97280   ;;  %vm163_vm1 = vcmask 1045504   ;;  %s2247_s0 = inlined_call_operand.vmem [shape: bf16[2,16,140], index: 0, kind: input, shape index: {}]   ;;  %s2248_s1 = inlined_call_operand.vmem [shape: bf16[2,16,140], index: 1, kind: input, shape index: {}]   ;;  %s2249_s2 = inlined_call_operand.vmem [shape: bf16[140,256], index: 2, kind: input, shape index: {}]   ;;  %s2250_s3 = inlined_call_operand.vmem [shape: bf16[640,256], index: 3, kind: input, shape index: {}]   ;;  %s2251_s4 = inlined_call_operand.vmem [shape: bf16[512,10], index: 4, kind: input, shape index: {}]   ;;  %s2252_s5 = inlined_call_operand.vmem [shape: f32[3,128], index: 5, kind: input, shape index: {}]   ;;  %s2253_s6 = inlined_call_operand.hbm [shape: f32[2,10], index: 6, kind: output, shape index: {}]  }
   0x1   :  { %v1553_v0 = vld [vmem:[%s2249_s2 + $0x4] ss:$8 sps:$4 sm:$0xff]   ;;  %v1555_v1 = vld [vmem:[%s2249_s2] ss:$8 sps:$4 sm:$0xff]   ;;  %v1556_v2 = vld [vmem:[%s2249_s2 + $0x14] ss:$8 sps:$4 sm:$0xff]  }
   0x2   :  { %170 = vmatprep.subr.bf16.mxu1 %v1553_v0  ;;  %v1558_v3 = vld [vmem:[%s2249_s2 + $0x10] ss:$8 sps:$4 sm:$0xff]   ;;  %v1559_v4 = vld [vmem:[%s2249_s2 + $0x24] ss:$8 sps:$4 sm:$0xff]   ;;  %v1561_v5 = vld [vmem:[%s2249_s2 + $0x20] ss:$8 sps:$4 sm:$0xff]  }
   0x3   :  { %171 = vmatpush1.bf16.msra.mxu1 %v1555_v1  ;;  %v1562_v6 = vld [vmem:[%s2249_s2 + $0x34] ss:$8 sps:$4 sm:$0xff]   ;;  %v1564_v7 = vld [vmem:[%s2249_s2 + $0x30] ss:$8 sps:$4 sm:$0xff]   ;;  %v1565_v8 = vld [vmem:[%s2249_s2 + $0x44] ss:$8 sps:$4 sm:$0xff]  }
   0x4   :  { %172 = vmatprep.subr.bf16.mxu1 %v1556_v2  ;;  %v1582_v9 = vld [vmem:[%s2247_s0 + $0x4] ss:$8 sps:$4 sm:$0xff]   ;;  %v1567_v10 = vld [vmem:[%s2249_s2 + $0x40] ss:$8 sps:$4 sm:$0xff]   ;;  %v1568_v11 = vld [vmem:[%s2249_s2 + $0x54] ss:$8 sps:$4 sm:$0xff]  }
   0x5   :  { %1375 = vmatprep.mubr.msk.bf16.mxu1 %vm156_vm0, %v1582_v9  ;;  %v1570_v12 = vld [vmem:[%s2249_s2 + $0x50] ss:$8 sps:$4 sm:$0xff]   ;;  %v1571_v13 = vld [vmem:[%s2249_s2 + $0x64] ss:$8 sps:$4 sm:$0xff]   ;;  %v1573_v14 = vld [vmem:[%s2249_s2 + $0x60] ss:$8 sps:$4 sm:$0xff]  }
   0x6   :  { %v1574_v15 = vld [vmem:[%s2249_s2 + $0x74] ss:$8 sps:$4 sm:$0xff]   ;;  %v1576_v16 = vld [vmem:[%s2249_s2 + $0x70] ss:$8 sps:$4 sm:$0xff]   ;;  %v1580_v20 = vld [vmem:[%s2247_s0] ss:$8 sps:$4 sm:$0xff]  }
   0x7   :  { %173 = vmatpush1.bf16.msra.mxu1 %v1558_v3  ;;  %v1577_v17 = vld [vmem:[%s2249_s2 + $0x84] ss:$8 sps:$4 sm:$0x3f]   ;;  %v1579_v18 = vld [vmem:[%s2249_s2 + $0x80] ss:$8 sps:$4 sm:$0x3f]  }
   0x8   :  { %174 = vmatprep.subr.bf16.mxu1 %v1559_v4  ;;  %v165_v19 = vsel %vm163_vm1, %v1579_v18, 0  ;;  %v1583_v21 = vld [vmem:[%s2247_s0 + $0x14] ss:$8 sps:$4 sm:$0xff]   ;;  %v1585_v22 = vld [vmem:[%s2247_s0 + $0x10] ss:$8 sps:$4 sm:$0xff]  }
   0x9   :  { %v1588_v23 = vld [vmem:[%s2248_s1 + $0x4] ss:$8 sps:$4 sm:$0xff]  }
   0xb   :  { %175 = vmatpush1.bf16.msra.mxu1 %v1561_v5 }
   0xc   :  { %176 = vmatprep.subr.bf16.mxu1 %v1562_v6 }
   0xf   :  { %177 = vmatpush1.bf16.msra.mxu1 %v1564_v7 }
  0x10   :  { %178 = vmatprep.subr.bf16.mxu1 %v1565_v8 }
  0x13   :  { %179 = vmatpush1.bf16.msra.mxu1 %v1567_v10 }
  0x14   :  { %180 = vmatprep.subr.bf16.mxu1 %v1568_v11 }
  0x17   :  { %181 = vmatpush1.bf16.msra.mxu1 %v1570_v12 }
  0x18   :  { %182 = vmatprep.subr.bf16.mxu1 %v1571_v13 }
  0x1b   :  { %183 = vmatpush1.bf16.msra.mxu1 %v1573_v14 }
  0x1c   :  { %184 = vmatprep.subr.bf16.mxu1 %v1574_v15 }
  0x1f   :  { %185 = vmatpush1.bf16.msra.mxu1 %v1576_v16 }
  0x20   :  { %1374 = vmatprep.subr.msk.bf16.mxu1 %vm163_vm1, %v1577_v17 }
  0x23   :  { %187 = vmatpush1.bf16.msra.mxu1 %v165_v19 }
  0x24   :  { %255 = vmatprep.subr.bf16.mxu1 %v1553_v0 }
  0x26   :  { %203 = vmatmul.mubr.bf16.vlgmr.msra.gmra.mrb[0].mxu1 %v1580_v20 }
  0x27   :  { %256 = vmatpush1.bf16.msra.mxu1 %v1555_v1  ;;  %1376 = vmatprep.mubr.msk.bf16.mxu1 %vm156_vm0, %v1583_v21 }
  0x28   :  { %257 = vmatprep.subr.bf16.mxu1 %v1556_v2 }
  0x2b   :  { %258 = vmatpush1.bf16.msra.mxu1 %v1558_v3 }
  0x2c   :  { %259 = vmatprep.subr.bf16.mxu1 %v1559_v4 }
  0x2e   :  { %213 = vmatmul.mubr.bf16.gmra.mrb[4].mxu1 %v1585_v22 }
  0x2f   :  { %260 = vmatpush1.bf16.msra.mxu1 %v1561_v5  ;;  %1382 = vmatprep.mubr.msk.bf16.mxu1 %vm156_vm0, %v1588_v23 }
  0x30   :  { %261 = vmatprep.subr.bf16.mxu1 %v1562_v6 }
  0x33   :  { %262 = vmatpush1.bf16.msra.mxu1 %v1564_v7 }
  0x34   :  { %263 = vmatprep.subr.bf16.mxu1 %v1565_v8 }
  0x37   :  { %264 = vmatpush1.bf16.msra.mxu1 %v1567_v10 }
  0x38   :  { %265 = vmatprep.subr.bf16.mxu1 %v1568_v11 }
  0x3b   :  { %266 = vmatpush1.bf16.msra.mxu1 %v1570_v12 }
  0x3c   :  { %267 = vmatprep.subr.bf16.mxu1 %v1571_v13 }
  0x3f   :  { %268 = vmatpush1.bf16.msra.mxu1 %v1573_v14 }
  0x40   :  { %269 = vmatprep.subr.bf16.mxu1 %v1574_v15 }
  0x41   :  { %11 = vsyncpa [#allocation4], 0  ;;  %v1586_v24 = vld [vmem:[%s2248_s1] ss:$8 sps:$4 sm:$0xff]   ;;  %v1589_v25 = vld [vmem:[%s2248_s1 + $0x14] ss:$8 sps:$4 sm:$0xff]  }
  0x42   :  { %v1591_v26 = vld [vmem:[%s2248_s1 + $0x10] ss:$8 sps:$4 sm:$0xff]   ;;  %v1592_v27 = vld [vmem:[%s2250_s3 + $0x4] ss:$8 sps:$4 sm:$0xff]   ;;  %v1594_v28 = vld [vmem:[%s2250_s3] ss:$8 sps:$4 sm:$0xff]  }
  0x43   :  { %270 = vmatpush1.bf16.msra.mxu1 %v1576_v16  ;;  %827 = vmatprep.subr.bf16.mxu0 %v1592_v27  ;;  %v1595_v29 = vld [vmem:[%s2250_s3 + $0x14] ss:$8 sps:$4 sm:$0xff]   ;;  %v1597_v30 = vld [vmem:[%s2250_s3 + $0x10] ss:$8 sps:$4 sm:$0xff]   ;;  %v1598_v31 = vld [vmem:[%s2250_s3 + $0x24] ss:$8 sps:$4 sm:$0xff]  }
  0x44   :  { %1381 = vmatprep.subr.msk.bf16.mxu1 %vm163_vm1, %v1577_v17  ;;  %828 = vmatpush1.bf16.msra.mxu0 %v1594_v28  ;;  %v1600_v32 = vld [vmem:[%s2250_s3 + $0x20] ss:$8 sps:$4 sm:$0xff]   ;;  %v1601_v33 = vld [vmem:[%s2250_s3 + $0x34] ss:$8 sps:$4 sm:$0xff]   ;;  %v1603_v34 = vld [vmem:[%s2250_s3 + $0x30] ss:$8 sps:$4 sm:$0xff]  }
  0x45   :  { %829 = vmatprep.subr.bf16.mxu0 %v1595_v29  ;;  %v1604_v35 = vld [vmem:[%s2250_s3 + $0x44] ss:$8 sps:$4 sm:$0xff]   ;;  %v1606_v36 = vld [vmem:[%s2250_s3 + $0x40] ss:$8 sps:$4 sm:$0xff]   ;;  %v1607_v37 = vld [vmem:[%s2250_s3 + $0x54] ss:$8 sps:$4 sm:$0xff]  }
  0x46   :  { %v1609_v38 = vld [vmem:[%s2250_s3 + $0x50] ss:$8 sps:$4 sm:$0xff]   ;;  %v1610_v39 = vld [vmem:[%s2250_s3 + $0x64] ss:$8 sps:$4 sm:$0xff]   ;;  %v1612_v40 = vld [vmem:[%s2250_s3 + $0x60] ss:$8 sps:$4 sm:$0xff]  }
  0x47   :  { %272 = vmatpush1.bf16.msra.mxu1 %v165_v19  ;;  %v1613_v41 = vld [vmem:[%s2250_s3 + $0x74] ss:$8 sps:$4 sm:$0xff]   ;;  %v1615_v42 = vld [vmem:[%s2250_s3 + $0x70] ss:$8 sps:$4 sm:$0xff]   ;;  %v1616_v43 = vld [vmem:[%s2250_s3 + $0x84] ss:$8 sps:$4 sm:$0xff]  }
  0x48   :  { %830 = vmatpush1.bf16.msra.mxu0 %v1597_v30  ;;  %v1618_v44 = vld [vmem:[%s2250_s3 + $0x80] ss:$8 sps:$4 sm:$0xff]   ;;  %v1619_v45 = vld [vmem:[%s2250_s3 + $0x94] ss:$8 sps:$4 sm:$0xff]   ;;  %v1621_v46 = vld [vmem:[%s2250_s3 + $0x90] ss:$8 sps:$4 sm:$0xff]  }
  0x49   :  { %831 = vmatprep.subr.bf16.mxu0 %v1598_v31  ;;  %v1622_v47 = vld [vmem:[%s2250_s3 + $0xa4] ss:$8 sps:$4 sm:$0xff]   ;;  %v1624_v48 = vld [vmem:[%s2250_s3 + $0xa0] ss:$8 sps:$4 sm:$0xff]   ;;  %v1625_v49 = vld [vmem:[%s2250_s3 + $0xb4] ss:$8 sps:$4 sm:$0xff]  }
  0x4a   :  { %288 = vmatmul.mubr.bf16.vlgmr.msra.gmra.mrb[8].mxu1 %v1586_v24  ;;  %v1627_v50 = vld [vmem:[%s2250_s3 + $0xb0] ss:$8 sps:$4 sm:$0xff]   ;;  %v1628_v51 = vld [vmem:[%s2250_s3 + $0xc4] ss:$8 sps:$4 sm:$0xff]   ;;  %v1630_v52 = vld [vmem:[%s2250_s3 + $0xc0] ss:$8 sps:$4 sm:$0xff]  }
  0x4b   :  { %1383 = vmatprep.mubr.msk.bf16.mxu1 %vm156_vm0, %v1589_v25  ;;  %v1631_v53 = vld [vmem:[%s2250_s3 + $0xd4] ss:$8 sps:$4 sm:$0xff]   ;;  %v1633_v54 = vld [vmem:[%s2250_s3 + $0xd0] ss:$8 sps:$4 sm:$0xff]   ;;  %v1634_v55 = vld [vmem:[%s2250_s3 + $0xe4] ss:$8 sps:$4 sm:$0xff]  }
  0x4c   :  { %832 = vmatpush1.bf16.msra.mxu0 %v1600_v32  ;;  %v1636_v56 = vld [vmem:[%s2250_s3 + $0xe0] ss:$8 sps:$4 sm:$0xff]   ;;  %v1637_v57 = vld [vmem:[%s2250_s3 + $0xf4] ss:$8 sps:$4 sm:$0xff]   ;;  %v1639_v58 = vld [vmem:[%s2250_s3 + $0xf0] ss:$8 sps:$4 sm:$0xff]  }
  0x4d   :  { %833 = vmatprep.subr.bf16.mxu0 %v1601_v33  ;;  %v1642_v59 = vld [vmem:[%s2250_s3 + $0x104] ss:$8 sps:$4 sm:$0xff]   ;;  %v1384_v16 = vld [vmem:[%s2252_s5] ss:$0 sm:$0xff]  ;;  %v1716_v18 = vld [vmem:[%s2251_s4 + $0x50] sm:$0xff]   ;;  %vm977_vm2 = vcmask 1041409  }
  0x4e   :  { %v1712_v8 = vld [vmem:[%s2251_s4 + $0x40] sm:$0xff]   ;;  %v1714_v10 = vld [vmem:[%s2251_s4 + $0x48] sm:$0xff]   ;;  %v1717_v23 = vld [vmem:[%s2251_s4 + $0x10] sm:$0xff]   ;;  %s1769_s10 = smov [#allocation3]   ;;  %vm1336_vm3 = vcmask 74752  }
  0x4f   :  { %v1713_v9 = vld [vmem:[%s2251_s4] sm:$0xff]   ;;  %1499 = vmatprep.subr.bf16.mxu1 %v1712_v8  ;;  %v1715_v15 = vld [vmem:[%s2251_s4 + $0x8] sm:$0xff]   ;;  %v1718_v24 = vld [vmem:[%s2251_s4 + $0x58] sm:$0xff]   ;;  %s1344_s11 = sshll.u32 %s1769_s10, 4  ;;  %s1345_s11 = int_to_ptr.vmem [resolvable:$true] %s1344_s11 }
  0x50   :  { %834 = vmatpush1.bf16.msra.mxu0 %v1603_v34  ;;  %1500 = vmatpush3.bf16.msra.mxu1 %v1713_v9  ;;  %v1681_v8 = vld [vmem:[%s2250_s3 + $0x1d4] ss:$8 sps:$4 sm:$0xff]   ;;  %v1679_v9 = vld [vmem:[%s2250_s3 + $0x1d0] ss:$8 sps:$4 sm:$0xff]   ;;  %p1749_p1 = scmp.lt.s32.totalorder %s1345_s11, %s1345_s11 }
  0x51   :  { %835 = vmatprep.subr.bf16.mxu0 %v1604_v35  ;;  %1501 = vmatprep.subr.bf16.mxu1 %v1714_v10  ;;  %v1684_v10 = vld [vmem:[%s2250_s3 + $0x1e4] ss:$8 sps:$4 sm:$0xff]  }
  0x52   :  { %298 = vmatmul.mubr.bf16.gmra.mrb[12].mxu1 %v1591_v26 }
  0x54   :  { %836 = vmatpush1.bf16.msra.mxu0 %v1606_v36  ;;  %1502 = vmatpush3.bf16.msra.mxu1 %v1715_v15 }
  0x55   :  { %837 = vmatprep.subr.bf16.mxu0 %v1607_v37  ;;  %1503 = vmatprep.subr.bf16.mxu1 %v1716_v18 }
  0x58   :  { %838 = vmatpush1.bf16.msra.mxu0 %v1609_v38  ;;  %1504 = vmatpush3.bf16.msra.mxu1 %v1717_v23  ;;  %v1694_v23 = vld [vmem:[%s2250_s3 + $0x220] ss:$8 sps:$4 sm:$0xff]  }
  0x59   :  { %839 = vmatprep.subr.bf16.mxu0 %v1610_v39  ;;  %1505 = vmatprep.subr.bf16.mxu1 %v1718_v24  ;;  %v1699_v24 = vld [vmem:[%s2250_s3 + $0x234] ss:$8 sps:$4 sm:$0xff]  }
  0x5c   :  { %840 = vmatpush1.bf16.msra.mxu0 %v1612_v40 }
  0x5d   :  { %841 = vmatprep.subr.bf16.mxu0 %v1613_v41 }
  0x60   :  { %842 = vmatpush1.bf16.msra.mxu0 %v1615_v42 }
  0x61   :  { %843 = vmatprep.subr.bf16.mxu0 %v1616_v43 }
  0x64   :  { %844 = vmatpush1.bf16.msra.mxu0 %v1618_v44 }
  0x65   :  { %845 = vmatprep.subr.bf16.mxu0 %v1619_v45  ;;  %v1640_v45 = vld [vmem:[%s2250_s3 + $0x100] ss:$8 sps:$4 sm:$0xff]  }
  0x68   :  { %846 = vmatpush1.bf16.msra.mxu0 %v1621_v46 }
  0x69   :  { %847 = vmatprep.subr.bf16.mxu0 %v1622_v47  ;;  %v1645_v47 = vld [vmem:[%s2250_s3 + $0x114] ss:$8 sps:$4 sm:$0xff]  }
  0x6c   :  { %848 = vmatpush1.bf16.msra.mxu0 %v1624_v48 }
  0x6d   :  { %849 = vmatprep.subr.bf16.mxu0 %v1625_v49  ;;  %v1643_v49 = vld [vmem:[%s2250_s3 + $0x110] ss:$8 sps:$4 sm:$0xff]  }
  0x70   :  { %850 = vmatpush1.bf16.msra.mxu0 %v1627_v50  ;;  %v1648_v50 = vld [vmem:[%s2250_s3 + $0x124] ss:$8 sps:$4 sm:$0xff]  }
  0x71   :  { %851 = vmatprep.subr.bf16.mxu0 %v1628_v51  ;;  %v1646_v51 = vld [vmem:[%s2250_s3 + $0x120] ss:$8 sps:$4 sm:$0xff]  }
  0x74   :  { %852 = vmatpush1.bf16.msra.mxu0 %v1630_v52  ;;  %v1651_v52 = vld [vmem:[%s2250_s3 + $0x134] ss:$8 sps:$4 sm:$0xff]  }
  0x75   :  { %853 = vmatprep.subr.bf16.mxu0 %v1631_v53  ;;  %v1649_v53 = vld [vmem:[%s2250_s3 + $0x130] ss:$8 sps:$4 sm:$0xff]  }
  0x78   :  { %854 = vmatpush1.bf16.msra.mxu0 %v1633_v54  ;;  %v1654_v54 = vld [vmem:[%s2250_s3 + $0x144] ss:$8 sps:$4 sm:$0xff]  }
  0x79   :  { %855 = vmatprep.subr.bf16.mxu0 %v1634_v55  ;;  %v1652_v55 = vld [vmem:[%s2250_s3 + $0x140] ss:$8 sps:$4 sm:$0xff]  }
  0x7c   :  { %856 = vmatpush1.bf16.msra.mxu0 %v1636_v56  ;;  %v1657_v56 = vld [vmem:[%s2250_s3 + $0x154] ss:$8 sps:$4 sm:$0xff]  }
  0x7d   :  { %857 = vmatprep.subr.bf16.mxu0 %v1637_v57  ;;  %v1655_v57 = vld [vmem:[%s2250_s3 + $0x150] ss:$8 sps:$4 sm:$0xff]  }
  0x80   :  { %858 = vmatpush1.bf16.msra.mxu0 %v1639_v58  ;;  %v1660_v58 = vld [vmem:[%s2250_s3 + $0x164] ss:$8 sps:$4 sm:$0xff]  }
  0x81   :  { %870 = vmatprep.subr.bf16.mxu0 %v1642_v59  ;;  %v1658_v59 = vld [vmem:[%s2250_s3 + $0x160] ss:$8 sps:$4 sm:$0xff]  }
  0xf9   :  { %v204_v60 = vpop.f32.mrb[0].mxu1 }
  0xfa   :  { %v206_v61 = vpop.f32.mrb[1].mxu1 }
  0xfb   :  { %v223_v62 = vmax.f32 %v204_v60, %v206_v61  ;;  %v208_v63 = vpop.f32.mrb[2].mxu1  ;;  %v1663_v60 = vld [vmem:[%s2250_s3 + $0x174] ss:$8 sps:$4 sm:$0xff]   ;;  %v1661_v61 = vld [vmem:[%s2250_s3 + $0x170] ss:$8 sps:$4 sm:$0xff]  }
  0xfc   :  { %v210_v0 = vpop.f32.mrb[3].mxu1 }
  0xfd   :  { %v224_v1 = vmax.f32 %v208_v63, %v210_v0  ;;  %v1664_v63 = vld [vmem:[%s2250_s3 + $0x180] ss:$8 sps:$4 sm:$0xff]   ;;  %v1669_v0 = vld [vmem:[%s2250_s3 + $0x194] ss:$8 sps:$4 sm:$0xff]  }
 0x101   :  { %v214_v2 = vpop.f32.mrb[4].mxu1 }
 0x102   :  { %v216_v3 = vpop.f32.mrb[5].mxu1 }
 0x103   :  { %v225_v4 = vmax.f32 %v214_v2, %v216_v3  ;;  %v218_v5 = vpop.f32.mrb[6].mxu1  ;;  %v1672_v2 = vld [vmem:[%s2250_s3 + $0x1a4] ss:$8 sps:$4 sm:$0xff]   ;;  %v1670_v3 = vld [vmem:[%s2250_s3 + $0x1a0] ss:$8 sps:$4 sm:$0xff]  }
 0x104   :  { %v220_v6 = vpop.f32.mrb[7].mxu1 }
 0x105   :  { %v226_v7 = vmax.f32 %v218_v5, %v220_v6  ;;  %v1673_v5 = vld [vmem:[%s2250_s3 + $0x1b0] ss:$8 sps:$4 sm:$0xff]   ;;  %v1678_v6 = vld [vmem:[%s2250_s3 + $0x1c4] ss:$8 sps:$4 sm:$0xff]  }
 0x11d   :  { %v289_v11 = vpop.f32.mrb[8].mxu1 }
 0x11e   :  { %v291_v12 = vpop.f32.mrb[9].mxu1 }
 0x11f   :  { %v308_v13 = vmax.f32 %v289_v11, %v291_v12  ;;  %v293_v14 = vpop.f32.mrb[10].mxu1  ;;  %v1682_v11 = vld [vmem:[%s2250_s3 + $0x1e0] ss:$8 sps:$4 sm:$0xff]   ;;  %v1687_v12 = vld [vmem:[%s2250_s3 + $0x1f4] ss:$8 sps:$4 sm:$0xff]  }
 0x120   :  { %v295_v17 = vpop.f32.mrb[11].mxu1 }
 0x121   :  { %v312_v19 = vmax.f32 %v223_v62, %v308_v13  ;;  %v309_v20 = vmax.f32 %v293_v14, %v295_v17  ;;  %v1666_v62 = vld [vmem:[%s2250_s3 + $0x184] ss:$8 sps:$4 sm:$0xff]   ;;  %v1685_v13 = vld [vmem:[%s2250_s3 + $0x1f0] ss:$8 sps:$4 sm:$0xff]   ;;  %v1688_v17 = vld [vmem:[%s2250_s3 + $0x200] ss:$8 sps:$4 sm:$0xff]  }
 0x122   :  { %v1690_v14 = vld [vmem:[%s2250_s3 + $0x204] ss:$8 sps:$4 sm:$0xff]  }
 0x123   :  { %v320_v21 = vadd.f32 %v1384_v16, %v312_v19  ;;  %v313_v22 = vmax.f32 %v224_v1, %v309_v20  ;;  %v1667_v1 = vld [vmem:[%s2250_s3 + $0x190] ss:$8 sps:$4 sm:$0xff]   ;;  %v1693_v19 = vld [vmem:[%s2250_s3 + $0x214] ss:$8 sps:$4 sm:$0xff]  }
 0x124   :  { %v1691_v20 = vld [vmem:[%s2250_s3 + $0x210] ss:$8 sps:$4 sm:$0xff]  }
 0x125   :  { %v324_v25 = vmax.f32 %v320_v21, 0.0  ;;  %v321_v26 = vadd.f32 %v1384_v16, %v313_v22  ;;  %v299_v27 = vpop.f32.mrb[12].mxu1  ;;  %v1768_v21 = vmov 0   ;;  %v1696_v22 = vld [vmem:[%s2250_s3 + $0x224] ss:$8 sps:$4 sm:$0xff]  }
 0x126   :  { %v301_v28 = vpop.f32.mrb[13].mxu1 }
 0x127   :  { %328 = vst [vmem:[#allocation2] sm:$0xff] %v324_v25  ;;  %v325_v29 = vmax.f32 %v321_v26, 0.0  ;;  %v310_v30 = vmax.f32 %v299_v27, %v301_v28  ;;  %v303_v31 = vpop.f32.mrb[14].mxu1  ;;  %v1702_v26 = vld [vmem:[%s2250_s3 + $0x244] ss:$8 sps:$4 sm:$0xff]  }
 0x128   :  { %v305_v32 = vpop.f32.mrb[15].mxu1  ;;  %v1700_v27 = vld [vmem:[%s2250_s3 + $0x240] ss:$8 sps:$4 sm:$0xff]   ;;  %v1705_v28 = vld [vmem:[%s2250_s3 + $0x254] ss:$8 sps:$4 sm:$0xff]  }
 0x129   :  { %329 = vst [vmem:[#allocation2 + $0x8] sm:$0xff] %v325_v29  ;;  %v314_v33 = vmax.f32 %v225_v4, %v310_v30  ;;  %v311_v34 = vmax.f32 %v303_v31, %v305_v32  ;;  %v1675_v4 = vld [vmem:[%s2250_s3 + $0x1b4] ss:$8 sps:$4 sm:$0xff]   ;;  %v1703_v29 = vld [vmem:[%s2250_s3 + $0x250] ss:$8 sps:$4 sm:$0xff]  }
 0x12a   :  { %v1708_v30 = vld [vmem:[%s2250_s3 + $0x264] ss:$8 sps:$4 sm:$0xff]   ;;  %v1706_v31 = vld [vmem:[%s2250_s3 + $0x260] ss:$8 sps:$4 sm:$0xff]   ;;  %v1711_v32 = vld [vmem:[%s2250_s3 + $0x274] ss:$8 sps:$4 sm:$0xff]  }
 0x12b   :  { %v322_v35 = vadd.f32 %v1384_v16, %v314_v33  ;;  %v315_v36 = vmax.f32 %v226_v7, %v311_v34  ;;  %v1676_v7 = vld [vmem:[%s2250_s3 + $0x1c0] ss:$8 sps:$4 sm:$0xff]   ;;  %v1709_v33 = vld [vmem:[%s2250_s3 + $0x270] ss:$8 sps:$4 sm:$0xff]  }
 0x12d   :  { %v326_v37 = vmax.f32 %v322_v35, 0.0  ;;  %v323_v38 = vadd.f32 %v1384_v16, %v315_v36 }
 0x12f   :  { %330 = vst [vmem:[#allocation2 + $0x10] sm:$0xff] %v326_v37  ;;  %v327_v39 = vmax.f32 %v323_v38, 0.0  ;;  %v342_v40 = vpack.c.bf16 %v326_v37, %v324_v25  ;;  %v1697_v25 = vld [vmem:[%s2250_s3 + $0x230] ss:$8 sps:$4 sm:$0xff]   ;;  %v1720_v38 = vld [vmem:[%s2251_s4 + $0x60] sm:$0xff]  }
 0x130   :  { %v334_v41 = vld [vmem:[#allocation2 + $0x1] sm:$0xff]  ;;  %v1719_v37 = vld [vmem:[%s2251_s4 + $0x18] sm:$0xff]  }
 0x131   :  { %331 = vst [vmem:[#allocation2 + $0x18] sm:$0xff] %v327_v39  ;;  %v338_v46 = vld [vmem:[#allocation2 + $0x3] sm:$0xff]  ;;  %1506 = vmatpush3.bf16.msra.mxu1 %v1719_v37 }
 0x132   :  { %v336_v16 = vld [vmem:[#allocation2 + $0x2] sm:$0xff]  ;;  %1507 = vmatprep.subr.bf16.mxu1 %v1720_v38 }
 0x133   :  { %v340_v35 = vld [vmem:[#allocation2 + $0x4] sm:$0xff] }
 0x134   :  { %v1721_v39 = vld [vmem:[%s2251_s4 + $0x20] sm:$0xff]  }
 0x135   :  { %1508 = vmatpush3.bf16.msra.mxu1 %v1721_v39 }
 0x138   :  { %v335_v42 = vld [vmem:[#allocation2 + $0x11] sm:$0xff] }
 0x139   :  { %v339_v43 = vld [vmem:[#allocation2 + $0x13] sm:$0xff]  ;;  %v343_v44 = vpack.c.bf16 %v335_v42, %v334_v41  ;;  %v1723_v41 = vld [vmem:[%s2251_s4 + $0x28] sm:$0xff]  }
 0x13a   :  { %v345_v48 = vpack.c.bf16 %v339_v43, %v338_v46  ;;  %v337_v15 = vld [vmem:[#allocation2 + $0x12] sm:$0xff]  ;;  %v1728_v46 = vld [vmem:[%s2251_s4 + $0xc0] sm:$0xff]  }
 0x13b   :  { %859 = vmatprep.mubr.bf16.mxu0 %v343_v44  ;;  %v344_v18 = vpack.c.bf16 %v337_v15, %v336_v16  ;;  %v341_v34 = vld [vmem:[#allocation2 + $0x14] sm:$0xff] }
 0x13c   :  { %860 = vmatmul.mubr.bf16.vlgmr.msra.gmra.mrb[0].mxu0 %v342_v40  ;;  %v346_v36 = vpack.c.bf16 %v341_v34, %v340_v35  ;;  %v1722_v40 = vld [vmem:[%s2251_s4 + $0x68] sm:$0xff]   ;;  %v1724_v42 = vld [vmem:[%s2251_s4 + $0x70] sm:$0xff]   ;;  %v1726_v44 = vld [vmem:[%s2251_s4 + $0x78] sm:$0xff]  }
 0x13d   :  { %871 = vmatpush1.bf16.msra.mxu0 %v1640_v45  ;;  %902 = vmatprep.mubr.bf16.mxu0 %v345_v48  ;;  %v1725_v43 = vld [vmem:[%s2251_s4 + $0x30] sm:$0xff]   ;;  %v1727_v45 = vld [vmem:[%s2251_s4 + $0x38] sm:$0xff]   ;;  %v1465_v48 = vld [vmem:[%s2252_s5 + $0x1] ss:$0 sm:$0xff] }
 0x13e   :  { %872 = vmatprep.subr.bf16.mxu0 %v1645_v47  ;;  %1509 = vmatprep.subr.bf16.mxu1 %v1722_v40  ;;  %v1732_v15 = vld [vmem:[%s2251_s4 + $0xd0] sm:$0xff]  }
 0x13f   :  { %1510 = vmatpush3.bf16.msra.mxu1 %v1723_v41  ;;  %v1733_v16 = vld [vmem:[%s2251_s4 + $0x90] sm:$0xff]  }
 0x140   :  { %1511 = vmatprep.subr.bf16.mxu1 %v1724_v42 }
 0x141   :  { %873 = vmatpush1.bf16.msra.mxu0 %v1643_v49 }
 0x142   :  { %874 = vmatprep.subr.bf16.mxu0 %v1648_v50 }
 0x143   :  { %1512 = vmatpush3.bf16.msra.mxu1 %v1725_v43 }
 0x144   :  { %1513 = vmatprep.subr.bf16.mxu1 %v1726_v44 }
 0x145   :  { %875 = vmatpush1.bf16.msra.mxu0 %v1646_v51 }
 0x146   :  { %876 = vmatprep.subr.bf16.mxu0 %v1651_v52 }
 0x147   :  { %1514 = vmatpush3.bf16.msra.mxu1 %v1727_v45 }
 0x148   :  { %1521 = vmatprep.subr.bf16.mxu1 %v1728_v46 }
 0x149   :  { %877 = vmatpush1.bf16.msra.mxu0 %v1649_v53 }
 0x14a   :  { %878 = vmatprep.subr.bf16.mxu0 %v1654_v54 }
 0x14d   :  { %879 = vmatpush1.bf16.msra.mxu0 %v1652_v55 }
 0x14e   :  { %880 = vmatprep.subr.bf16.mxu0 %v1657_v56 }
 0x151   :  { %881 = vmatpush1.bf16.msra.mxu0 %v1655_v57 }
 0x152   :  { %882 = vmatprep.subr.bf16.mxu0 %v1660_v58 }
 0x155   :  { %883 = vmatpush1.bf16.msra.mxu0 %v1658_v59 }
 0x156   :  { %884 = vmatprep.subr.bf16.mxu0 %v1663_v60 }
 0x159   :  { %885 = vmatpush1.bf16.msra.mxu0 %v1661_v61 }
 0x15a   :  { %886 = vmatprep.subr.bf16.mxu0 %v1666_v62 }
 0x15d   :  { %887 = vmatpush1.bf16.msra.mxu0 %v1664_v63 }
 0x15e   :  { %888 = vmatprep.subr.bf16.mxu0 %v1669_v0 }
 0x161   :  { %889 = vmatpush1.bf16.msra.mxu0 %v1667_v1 }
 0x162   :  { %890 = vmatprep.subr.bf16.mxu0 %v1672_v2 }
 0x165   :  { %891 = vmatpush1.bf16.msra.mxu0 %v1670_v3 }
 0x166   :  { %892 = vmatprep.subr.bf16.mxu0 %v1675_v4 }
 0x169   :  { %893 = vmatpush1.bf16.msra.mxu0 %v1673_v5 }
 0x16a   :  { %894 = vmatprep.subr.bf16.mxu0 %v1678_v6 }
 0x16d   :  { %895 = vmatpush1.bf16.msra.mxu0 %v1676_v7 }
 0x16e   :  { %896 = vmatprep.subr.bf16.mxu0 %v1681_v8 }
 0x171   :  { %897 = vmatpush1.bf16.msra.mxu0 %v1679_v9 }
 0x172   :  { %898 = vmatprep.subr.bf16.mxu0 %v1684_v10 }
 0x175   :  { %899 = vmatpush1.bf16.msra.mxu0 %v1682_v11  ;;  %v1729_v11 = vld [vmem:[%s2251_s4 + $0x80] sm:$0xff]  }
 0x176   :  { %900 = vmatprep.subr.bf16.mxu0 %v1687_v12  ;;  %v1730_v12 = vld [vmem:[%s2251_s4 + $0xc8] sm:$0xff]  }
 0x179   :  { %901 = vmatpush1.bf16.msra.mxu0 %v1685_v13 }
 0x17a   :  { %913 = vmatprep.subr.bf16.mxu0 %v1690_v14  ;;  %v1731_v14 = vld [vmem:[%s2251_s4 + $0x88] sm:$0xff]  }
 0x17c   :  { %903 = vmatmul.mubr.bf16.vlgmr.msra.gmra.mrb[0].mxu0 %v344_v18  ;;  %v1735_v18 = vld [vmem:[%s2251_s4 + $0x98] sm:$0xff]  }
 0x17d   :  { %914 = vmatpush1.bf16.msra.mxu0 %v1688_v17  ;;  %945 = vmatprep.mubr.bf16.mxu0 %v1768_v21  ;;  %v1734_v17 = vld [vmem:[%s2251_s4 + $0xd8] sm:$0xff]   ;;  %v1738_v21 = vld [vmem:[%s2251_s4 + $0xe8] sm:$0xff]  }
 0x17e   :  { %915 = vmatprep.subr.bf16.mxu0 %v1693_v19  ;;  %v1736_v19 = vld [vmem:[%s2251_s4 + $0xe0] sm:$0xff]  }
 0x181   :  { %916 = vmatpush1.bf16.msra.mxu0 %v1691_v20  ;;  %v1737_v20 = vld [vmem:[%s2251_s4 + $0xa0] sm:$0xff]  }
 0x182   :  { %917 = vmatprep.subr.bf16.mxu0 %v1696_v22  ;;  %v1739_v22 = vld [vmem:[%s2251_s4 + $0xa8] sm:$0xff]  }
 0x185   :  { %918 = vmatpush1.bf16.msra.mxu0 %v1694_v23  ;;  %v1740_v23 = vld [vmem:[%s2251_s4 + $0xf0] sm:$0xff]  }
 0x186   :  { %919 = vmatprep.subr.bf16.mxu0 %v1699_v24  ;;  %v1741_v24 = vld [vmem:[%s2251_s4 + $0xb0] sm:$0xff]  }
 0x189   :  { %920 = vmatpush1.bf16.msra.mxu0 %v1697_v25  ;;  %v1742_v25 = vld [vmem:[%s2251_s4 + $0xf8] sm:$0xff]  }
 0x18a   :  { %921 = vmatprep.subr.bf16.mxu0 %v1702_v26  ;;  %v1743_v26 = vld [vmem:[%s2251_s4 + $0xb8] sm:$0xff]   ;;  %s1744_s4 = scalar_lea.vmem %s1345_s11, 32 }
 0x18b   :  { %p1745_p0 = scmp.ne.s32.totalorder %s1345_s11, %s1744_s4  ;;  %p1750_p2 = scmp.lt.s32.totalorder %s1744_s4, %s1744_s4 }
 0x18d   :  { %922 = vmatpush1.bf16.msra.mxu0 %v1700_v27  ;;  %p1751_p3 = por %p1750_p2, %p1749_p1 }
 0x18e   :  { %923 = vmatprep.subr.bf16.mxu0 %v1705_v28 }
 0x18f   :  { %p1752_p4 = pnand %p1751_p3, %p1745_p0 }
 0x191   :  { %924 = vmatpush1.bf16.msra.mxu0 %v1703_v29 }
 0x192   :  { %925 = vmatprep.subr.bf16.mxu0 %v1708_v30 }
 0x195   :  { %926 = vmatpush1.bf16.msra.mxu0 %v1706_v31 }
 0x196   :  { %927 = vmatprep.subr.bf16.mxu0 %v1711_v32 }
 0x199   :  { %928 = vmatpush1.bf16.msra.mxu0 %v1709_v33  ;;  %v1466_v33 = vld [vmem:[%s2252_s5 + $0x2] ss:$0 sm:$0xff] }
 0x19c   :  { %946 = vmatmul.mubr.bf16.vlgmr.msra.gmra.mrb[0].mxu0 %v346_v36 }
 0x26f   :  { %v947_v47 = vpop.f32.mrb[0].mxu0 }
 0x270   :  { %v949_v49 = vpop.f32.mrb[1].mxu0 }
 0x271   :  { %v956_v50 = vmax.f32 %v947_v47, %v949_v49  ;;  %v951_v51 = vpop.f32.mrb[2].mxu0 }
 0x272   :  { %v953_v52 = vpop.f32.mrb[3].mxu0 }
 0x273   :  { %v962_v53 = vadd.f32 %v1465_v48, %v956_v50  ;;  %v957_v54 = vmax.f32 %v951_v51, %v953_v52 }
 0x275   :  { %v964_v55 = vmax.f32 %v962_v53, 0.0  ;;  %v963_v56 = vadd.f32 %v1465_v48, %v957_v54 }
 0x277   :  { %v968_v57 = vrot.slane %v964_v55, 1  ;;  %v965_v58 = vmax.f32 %v963_v56, 0.0 }
 0x279   :  { %v972_v59 = vmax.f32 %v964_v55, %v968_v57  ;;  %v969_v60 = vrot.slane %v965_v58, 1 }
 0x27b   :  { %v973_v61 = vmax.f32 %v965_v58, %v969_v60  ;;  %v980_v62 = vrot.slane %v972_v59, 2  ;;  %v988_v63 = vrot.slane %v972_v59, 6  ;;  %v984_v0 = vrot.slane %v972_v59, 4 }
 0x27d   :  { %v976_v1 = vrot.slane %v973_v61, 7  ;;  %v981_v2 = vrot.slane %v973_v61, 1  ;;  %v989_v3 = vrot.slane %v973_v61, 5  ;;  %v985_v4 = vrot.slane %v973_v61, 3 }
 0x27f   :  { %v982_v5 = vsel %vm977_vm2, %v981_v2, %v980_v62  ;;  %v978_v6 = vsel %vm977_vm2, %v976_v1, %v972_v59  ;;  %v990_v7 = vsel %vm977_vm2, %v989_v3, %v988_v63  ;;  %v986_v8 = vsel %vm977_vm2, %v985_v4, %v984_v0 }
 0x280   :  { %v993_v9 = vpack.c.bf16 %v982_v5, %v982_v5  ;;  %v992_v10 = vpack.c.bf16 %v978_v6, %v978_v6  ;;  %v995_v13 = vpack.c.bf16 %v990_v7, %v990_v7  ;;  %v994_v27 = vpack.c.bf16 %v986_v8, %v986_v8 }
 0x282   :  { %1288 = vmatprep.mubr.bf16.mxu1 %v993_v9 }
 0x283   :  { %1289 = vmatmul.mubr.bf16.vlgmr.msra.gmra.mrb[16].mxu1 %v992_v10 }
 0x284   :  { %1522 = vmatpush3.bf16.msra.mxu1 %v1729_v11  ;;  %1328 = vmatprep.mubr.bf16.mxu1 %v995_v13 }
 0x285   :  { %1523 = vmatprep.subr.bf16.mxu1 %v1730_v12 }
 0x288   :  { %1524 = vmatpush3.bf16.msra.mxu1 %v1731_v14 }
 0x289   :  { %1525 = vmatprep.subr.bf16.mxu1 %v1732_v15 }
 0x28c   :  { %1526 = vmatpush3.bf16.msra.mxu1 %v1733_v16 }
 0x28d   :  { %1527 = vmatprep.subr.bf16.mxu1 %v1734_v17 }
 0x290   :  { %1528 = vmatpush3.bf16.msra.mxu1 %v1735_v18 }
 0x291   :  { %1529 = vmatprep.subr.bf16.mxu1 %v1736_v19 }
 0x294   :  { %1530 = vmatpush3.bf16.msra.mxu1 %v1737_v20 }
 0x295   :  { %1531 = vmatprep.subr.bf16.mxu1 %v1738_v21 }
 0x298   :  { %1532 = vmatpush3.bf16.msra.mxu1 %v1739_v22 }
 0x299   :  { %1533 = vmatprep.subr.bf16.mxu1 %v1740_v23 }
 0x29c   :  { %1534 = vmatpush3.bf16.msra.mxu1 %v1741_v24 }
 0x29d   :  { %1535 = vmatprep.subr.bf16.mxu1 %v1742_v25 }
 0x2a0   :  { %1536 = vmatpush3.bf16.msra.mxu1 %v1743_v26 }
 0x2a3   :  { %1329 = vmatmul.mubr.bf16.vlgmr.msra.gmra.mrb[20].mxu1 %v994_v27 }
 0x356   :  { %v1515_v28 = vpop.f32.mrb[16].mxu1 }
 0x357   :  { %v1516_v29 = vpop.f32.mrb[17].mxu1 }
 0x358   :  { %v1517_v30 = vadd.f32 %v1516_v29, %v1515_v28  ;;  %v1518_v31 = vpop.f32.mrb[18].mxu1 }
 0x359   :  { %v1519_v32 = vpop.f32.mrb[19].mxu1 }
 0x35a   :  { %v1291_v36 = vadd.f32 %v1517_v30, %v1466_v33 }
 0x376   :  { %v1537_v34 = vpop.f32.mrb[20].mxu1 }
 0x377   :  { %v1538_v35 = vpop.f32.mrb[21].mxu1 }
 0x378   :  { %v1539_v37 = vadd.f32 %v1538_v35, %v1537_v34  ;;  %v1540_v38 = vpop.f32.mrb[22].mxu1 }
 0x379   :  { %v1541_v39 = vpop.f32.mrb[23].mxu1 }
 0x37a   :  { %v1331_v40 = vadd.f32 %v1539_v37, %v1291_v36 }
 0x37c   :  { %1337 = vst.msk [vmem:[#allocation3] sm:$0x3] %vm1336_vm3, %v1331_v40 }
 0x37d   :  { %1755 = shalt.err (!%p1752_p4)
}
 0x37e   :  { %s1756_s13 = scalar_lea.hbm %s2253_s6, 32 }
 0x37f   :  { %p1757_p5 = scmp.ne.s32.totalorder %s2253_s6, %s1756_s13  ;;  %p1760_p6 = scmp.lt.u32.totalorder %s1756_s13, %s2253_s6 }
 0x381   :  { %p1762_p7 = pnand %p1760_p6, %p1757_p5 }
 0x383   :  { %1765 = shalt.err (!%p1762_p7)
}
 0x384   :  { %1347 = dma.vmem_to_hbm [thread:$0]  %s1345_s11, 32, %s2253_s6, [#allocation4]  }
 0x385   :  { %1766 = dma.done.wait [#allocation4], 32  }
 0x386   :  { %1767 = vsyncadd [#allocation4], 4294967264 }
 0x387   :  { %1351 = vsyncpa [#allocation4], 1 }

</bundles_post_ra>
